<compile_context>
chip_gen: v6e
topology: v6e:2x2x1
jax: 0.10.0
libtpu: 0.0.40
codegen_flags: <defaults>
</compile_context>

<pallas_src>
import random

import numpy as np
import jax
import jax.numpy as jnp
from jax import lax
from jax.experimental import pallas as pl
from jax.experimental.pallas import tpu as pltpu


VSPEC = pl.BlockSpec(memory_space=pltpu.MemorySpace.VMEM)


def _vspecs(n):
    return [pl.BlockSpec(memory_space=pltpu.MemorySpace.VMEM)] * n


# ------------------------------- linear kernel ------------------------------ #

def _linear_kernel(x_ref, w_ref, b_ref, o_ref):
    o_ref[...] = (
        jnp.dot(x_ref[...], w_ref[...], preferred_element_type=jnp.float32)
        + b_ref[...]
    )


def linear(x, w, b):
    m, n = x.shape[0], w.shape[1]
    return pl.pallas_call(
        _linear_kernel,
        out_shape=jax.ShapeDtypeStruct((m, n), jnp.float32),
        in_specs=_vspecs(3),
        out_specs=VSPEC,
    )(x, w, b)


# ----------------------- fused encoder GRU recurrence ----------------------- #

def _enc_recurrence(gxb, wh_stack, *, S, B, H):
    """gxb: (2, S, B, 3H) precomputed x@W_i + b (dir 0 = fwd, dir 1 = bwd).
       wh_stack: (2, H, 3H) fused [r|z|n] hidden weights.
       returns hseq: (2, S, B, H) hidden state after each (actual) timestep."""

    def kernel(gx_ref, wh_ref, h_out_ref, h_scr):
        @pl.when(pl.program_id(1) == 0)
        def _():
            h_scr[...] = jnp.zeros_like(h_scr)

        h = h_scr[...]                                   # (B, H)
        gx = gx_ref[...]                                 # (B, 3H)
        gh = jnp.dot(h, wh_ref[...], preferred_element_type=jnp.float32)
        r = jax.nn.sigmoid(gx[:, :H] + gh[:, :H])
        z = jax.nn.sigmoid(gx[:, H:2 * H] + gh[:, H:2 * H])
        n = jnp.tanh(gx[:, 2 * H:] + r * gh[:, 2 * H:])
        h_new = (1.0 - z) * n + z * h
        h_scr[...] = h_new
        h_out_ref[...] = h_new

    def tmap(d, t):
        # forward direction walks t = 0..S-1, backward walks S-1..0
        return (d, t + d * (S - 1 - 2 * t), 0, 0)

    return pl.pallas_call(
        kernel,
        out_shape=jax.ShapeDtypeStruct((2, S, B, H), jnp.float32),
        grid=(2, S),
        in_specs=[
            pl.BlockSpec((None, None, B, 3 * H), tmap),
            pl.BlockSpec((None, H, 3 * H), lambda d, t: (d, 0, 0)),  # resident
        ],
        out_specs=pl.BlockSpec((None, None, B, H), tmap),
        scratch_shapes=[pltpu.VMEM((B, H), jnp.float32)],
        compiler_params=pltpu.CompilerParams(
            dimension_semantics=("parallel", "arbitrary")),
    )(gxb, wh_stack)


# ------------------ fused decoder step (attn + GRU + output) ---------------- #

def _make_dec_step(B, S, E, A, HD, EMB, VP, V):
    def kernel(emb_ref, h_ref, encb_ref, encp_ref, wq_ref, v_ref,
               wie_ref, wic_ref, wh_ref, b_ref,
               owh_ref, owc_ref, owe_ref, ob_ref,
               logits_ref, h_out_ref, idx_ref):
        emb = emb_ref[...]                               # (B, EMB)
        h = h_ref[...]                                   # (B, HD)
        encb = encb_ref[...]                             # (B, S, E)
        encp = encp_ref[...]                             # (B, S, A)

        # --- additive attention (batch-major; softmax along lanes) ---
        q = jnp.dot(h, wq_ref[...], preferred_element_type=jnp.float32)   # (B, A)
        energy = jnp.tanh(encp + q[:, None, :])                            # (B, S, A)
        scores = jnp.sum(energy * v_ref[...][None, :, :], axis=-1)         # (B, S)
        scores = scores - jnp.max(scores, axis=-1, keepdims=True)
        ex = jnp.exp(scores)
        attn = ex / jnp.sum(ex, axis=-1, keepdims=True)
        ctx = jnp.einsum("bqs,bse->bqe", attn[:, None, :], encb,
                         preferred_element_type=jnp.float32)[:, 0, :]      # (B, E)

        # --- GRU cell: fused [r|z|n] gates, split-K instead of input concat ---
        gx = (jnp.dot(emb, wie_ref[...], preferred_element_type=jnp.float32)
              + jnp.dot(ctx, wic_ref[...], preferred_element_type=jnp.float32)
              + b_ref[...])                                                # (B, 3HD)
        gh = jnp.dot(h, wh_ref[...], preferred_element_type=jnp.float32)   # (B, 3HD)
        r = jax.nn.sigmoid(gx[:, :HD] + gh[:, :HD])
        z = jax.nn.sigmoid(gx[:, HD:2 * HD] + gh[:, HD:2 * HD])
        n = jnp.tanh(gx[:, 2 * HD:] + r * gh[:, 2 * HD:])
        h_new = (1.0 - z) * n + z * h
        h_out_ref[...] = h_new

        # --- output projection (lane-padded vocab) + masked argmax ---
        logits = (jnp.dot(h_new, owh_ref[...], preferred_element_type=jnp.float32)
                  + jnp.dot(ctx, owc_ref[...], preferred_element_type=jnp.float32)
                  + jnp.dot(emb, owe_ref[...], preferred_element_type=jnp.float32)
                  + ob_ref[...])                                           # (B, VP)
        logits_ref[...] = logits
        cols = lax.broadcasted_iota(jnp.int32, logits.shape, 1)
        masked = jnp.where(cols < V, logits, -jnp.inf)
        maxv = jnp.max(masked, axis=1, keepdims=True)
        idx_ref[...] = jnp.min(jnp.where(masked >= maxv, cols, VP),
                               axis=1, keepdims=True)

    def run(emb, h, encb, encp, wq, v, wie, wic, wh, b, owh, owc, owe, ob):
        return pl.pallas_call(
            kernel,
            out_shape=(
                jax.ShapeDtypeStruct((B, VP), jnp.float32),
                jax.ShapeDtypeStruct((B, HD), jnp.float32),
                jax.ShapeDtypeStruct((B, 1), jnp.int32),
            ),
            in_specs=_vspecs(14),
            out_specs=(VSPEC, VSPEC, VSPEC),
        )(emb, h, encb, encp, wq, v, wie, wic, wh, b, owh, owc, owe, ob)

    return run


# --------------------------------- forward ---------------------------------- #

def build_forward(cfg):
    HE = cfg["enc_hid_dim"]
    HD = cfg["dec_hid_dim"]
    A = cfg["attn_dim"]
    V = cfg["target_dim"]
    VP = cfg["target_dim_padded"]
    SOS = cfg["sos"]

    @jax.jit
    def forward(weights, ori, trg_steps, tf_flags):
        B, S = ori.shape
        E = 2 * HE
        EMB = weights["emb_dec"].shape[1]

        # ------------------------------ encoder ------------------------------ #
        emb = weights["emb_enc"][ori]                           # (B, S, EMB) gather
        emb_sf = jnp.transpose(emb, (1, 0, 2)).reshape(S * B, EMB)

        # input-gate projections for all timesteps & both directions: ONE matmul
        gxb = linear(emb_sf, weights["enc_wi_all"], weights["enc_b_all"])
        gxb = gxb.reshape(S, B, 2 * 3 * HE)
        gxb = jnp.stack([gxb[..., :3 * HE], gxb[..., 3 * HE:]], axis=0)  # (2,S,B,3HE)

        hseq = _enc_recurrence(gxb, weights["enc_wh_stack"], S=S, B=B, H=HE)

        enc_b = jnp.transpose(jnp.concatenate([hseq[0], hseq[1]], axis=-1),
                              (1, 0, 2))                        # (B, S, 2HE)
        h_fwd, h_bwd = hseq[0, S - 1], hseq[1, 0]

        # attention key pre-projection (once) + enc->dec hidden bridge
        enc_proj = linear(enc_b.reshape(B * S, E),
                          weights["attn_wk"], weights["attn_bk"]).reshape(B, S, A)
        h0 = linear(jnp.concatenate([h_fwd, h_bwd], axis=1),
                    weights["fc_w"], weights["fc_b"])           # (B, HD)

        # ------------------------------ decoder ------------------------------ #
        dec_step = _make_dec_step(B, S, E, A, HD, EMB, VP, V)
        first_in = jnp.full((B,), SOS, jnp.int32)

        def step(carry, xs):
            h, tok = carry
            trg_t, tf_t = xs
            emb_t = weights["emb_dec"][tok]                     # (B, EMB) gather
            logits, h_new, pred = dec_step(
                emb_t, h, enc_b, enc_proj,
                weights["attn_wq"], weights["attn_v"],
                weights["dec_wi_e"], weights["dec_wi_c"],
                weights["dec_wh"], weights["dec_b"],
                weights["out_w_h"], weights["out_w_c"], weights["out_w_e"],
                weights["out_b"])
            pred_tok = pred[:, 0]
            nxt = jnp.where(tf_t, trg_t, pred_tok)
            return (h_new, nxt), (logits, pred_tok)

        (_, _), (logits_seq, preds) = lax.scan(step, (h0, first_in),
                                               (trg_steps, tf_flags))

        # mirrors `torch.randn(1, batch, target_dim)` first output slot
        out0 = jax.random.normal(jax.random.PRNGKey(1), (1, B, V), jnp.float32)
        out = jnp.concatenate([out0, logits_seq[:, :, :V]], axis=0)  # (T, B, V)
        return jnp.swapaxes(out, 0, 1), preds                         # (B, T, V)

    return forward


def model_forward(fwd, weights, cfg, ori, trg=None, teacher_force_ratio=0.6,
                  max_len=20):
    B = ori.shape[0]
    if trg is not None:
        n_steps = trg.shape[1] - 1
        # one host-side random.random() per decode step, mirroring the PyTorch loop
        tf = jnp.asarray([random.random() < teacher_force_ratio
                          for _ in range(n_steps)], dtype=bool)
        trg_steps = jnp.transpose(trg[:, 1:]).astype(jnp.int32)   # (n_steps, B)
        out, _ = fwd(weights, ori, trg_steps, tf)
        return out

    # free-running: bounded device-side scan, one host round-trip to trim at EOS.
    # TODO(synk): original loops until all rows emit EOS with no bound; capped here.
    n_steps = max_len - 1
    trg_steps = jnp.zeros((n_steps, B), jnp.int32)
    tf = jnp.zeros((n_steps,), bool)
    out, preds = fwd(weights, ori, trg_steps, tf)
    preds = np.asarray(jax.device_get(preds))                     # (n_steps, B)
    seen = np.full((B,), cfg["sos"] == cfg["eos"], bool)
    stop = n_steps
    for k in range(n_steps):
        if seen.all():
            stop = k
            break
        seen |= preds[k] == cfg["eos"]
    return out[:, :1 + stop, :]


# ---------------------------------- init ------------------------------------ #

def init_model(key, vocab, emb_dim, enc_hid, dec_hid, attn_dim, target_dim,
               sos=0, eos=1, pad=3):
    ks = jax.random.split(key, 18)
    nrm = lambda k, sh: 0.1 * jax.random.normal(k, sh, jnp.float32)
    vp = ((target_dim + 127) // 128) * 128
    e = 2 * enc_hid

    def pad_cols(a):
        return jnp.pad(a, ((0, 0), (0, vp - a.shape[1])))

    weights = dict(
        emb_enc=nrm(ks[0], (vocab, emb_dim)),
        emb_dec=nrm(ks[1], (vocab, emb_dim)),
        # encoder GRU: gates fused [r|z|n]; fwd/bwd input projections fused along N
        enc_wi_all=nrm(ks[2], (emb_dim, 2 * 3 * enc_hid)),
        enc_b_all=nrm(ks[3], (1, 2 * 3 * enc_hid)),
        enc_wh_stack=nrm(ks[4], (2, enc_hid, 3 * enc_hid)),
        # decoder GRU: gates fused; input split into [embedding | context] blocks
        dec_wi_e=nrm(ks[5], (emb_dim, 3 * dec_hid)),
        dec_wi_c=nrm(ks[6], (e, 3 * dec_hid)),
        dec_wh=nrm(ks[7], (dec_hid, 3 * dec_hid)),
        dec_b=nrm(ks[8], (1, 3 * dec_hid)),
        # additive attention
        attn_wq=nrm(ks[9], (dec_hid, attn_dim)),
        attn_wk=nrm(ks[10], (e, attn_dim)),
        attn_bk=nrm(ks[11], (1, attn_dim)),
        attn_v=nrm(ks[12], (1, attn_dim)),
        # output projection, lane-padded to a multiple of 128 (zeros in pad cols)
        out_w_h=pad_cols(nrm(ks[13], (dec_hid, target_dim))),
        out_w_c=pad_cols(nrm(ks[14], (e, target_dim))),
        out_w_e=pad_cols(nrm(ks[15], (emb_dim, target_dim))),
        out_b=jnp.zeros((1, vp), jnp.float32),
        # enc_hid_fc bridge
        fc_w=nrm(ks[16], (e, dec_hid)),
        fc_b=jnp.zeros((1, dec_hid), jnp.float32),
    )
    cfg = dict(enc_hid_dim=enc_hid, dec_hid_dim=dec_hid, attn_dim=attn_dim,
               target_dim=target_dim, target_dim_padded=vp,
               sos=sos, eos=eos, pad=pad)
    return weights, cfg


if __name__ == "__main__":
    random.seed(0)  # deterministic teacher forcing (mirrors Python random.random())

    B, S, T_TRG = 2, 8, 6
    VOCAB = 24
    EMB = 16
    ENC_HID = 32
    DEC_HID = 32
    ATTN = 32
    TARGET_DIM = VOCAB

    key = jax.random.PRNGKey(0)
    kp, ko, kt = jax.random.split(key, 3)
    weights, cfg = init_model(kp, VOCAB, EMB, ENC_HID, DEC_HID, ATTN, TARGET_DIM)
    fwd = build_forward(cfg)

    ori = jax.random.randint(ko, (B, S), 0, VOCAB).astype(jnp.int32)
    trg = jax.random.randint(kt, (B, T_TRG), 0, VOCAB).astype(jnp.int32)

    out = model_forward(fwd, weights, cfg, ori, trg=trg, teacher_force_ratio=0.6)
    out = jax.block_until_ready(out)
    assert out.shape == (B, T_TRG, TARGET_DIM), out.shape
    assert out.dtype == jnp.float32
    print("KERNEL_OK")
</pallas_src>

<mosaic_0001>
module attributes {stable_mosaic.version = 11 : i64} {
  func.func @kernel(%arg0: i32, %arg1: i32, %arg2: memref<1x1x2x96xf32, #tpu.memory_space<vmem>>, %arg3: memref<1x32x96xf32, #tpu.memory_space<vmem>>, %arg4: memref<1x1x2x32xf32, #tpu.memory_space<vmem>>, %arg5: memref<2x32xf32, #tpu.memory_space<vmem>>) attributes {dimension_semantics = [#tpu.dimension_semantics<parallel>, #tpu.dimension_semantics<arbitrary>], iteration_bounds = array<i64: 2, 8>, scalar_prefetch = 0 : i64, scratch_operands = 1 : i64, tpu.core_type = #tpu.core_type<tc>, window_params = [{transform_indices = @transform_0, window_bounds = array<i64: 1, 1, 2, 96>}, {transform_indices = @transform_1, window_bounds = array<i64: 1, 32, 96>}, {transform_indices = @transform_2, window_bounds = array<i64: 1, 1, 2, 32>}]} {
    %c0_i32 = arith.constant 0 : i32
    %0 = arith.cmpi eq, %arg1, %c0_i32 : i32
    %1 = arith.extui %0 : i1 to i32
    %c0_i32_0 = arith.constant 0 : i32
    %2 = arith.cmpi ne, %1, %c0_i32_0 : i32
    scf.if %2 {
      %cst_18 = arith.constant 0.000000e+00 : f32
      %39 = vector.broadcast %cst_18 : f32 to vector<2x32xf32>
      %c0_19 = arith.constant 0 : index
      %c0_20 = arith.constant 0 : index
      %40 = vector.load %arg5[%c0_19, %c0_20] : memref<2x32xf32, #tpu.memory_space<vmem>>, vector<2x32xf32>
      tpu.vector_store %arg5[%c0_19, %c0_20], %39 {strides = array<i32>} : memref<2x32xf32, #tpu.memory_space<vmem>>, vector<2x32xf32>,
    } else {
    }
    %c0 = arith.constant 0 : index
    %c0_1 = arith.constant 0 : index
    %3 = vector.load %arg5[%c0, %c0_1] : memref<2x32xf32, #tpu.memory_space<vmem>>, vector<2x32xf32>
    %c0_2 = arith.constant 0 : index
    %c0_3 = arith.constant 0 : index
    %c0_4 = arith.constant 0 : index
    %c0_5 = arith.constant 0 : index
    %4 = vector.load %arg2[%c0_2, %c0_3, %c0_4, %c0_5] : memref<1x1x2x96xf32, #tpu.memory_space<vmem>>, vector<1x1x2x96xf32>
    %5 = vector.shape_cast %4 : vector<1x1x2x96xf32> to vector<2x96xf32>
    %c0_6 = arith.constant 0 : index
    %c0_7 = arith.constant 0 : index
    %c0_8 = arith.constant 0 : index
    %6 = vector.load %arg3[%c0_6, %c0_7, %c0_8] : memref<1x32x96xf32, #tpu.memory_space<vmem>>, vector<1x32x96xf32>
    %7 = vector.shape_cast %6 : vector<1x32x96xf32> to vector<32x96xf32>
    %cst = arith.constant dense<0.000000e+00> : vector<2x96xf32>
    %8 = tpu.matmul %3, %7, %cst {dimension_numbers = #tpu.dot_dimension_numbers<[1], [0], [0], [1], [0, 0, 1, 1], [], []>} : vector<2x32xf32>, vector<32x96xf32>, vector<2x96xf32> -> vector<2x96xf32>
    %9 = vector.extract_strided_slice %5 {offsets = [0, 0], sizes = [2, 32], strides = [1, 1]} : vector<2x96xf32> to vector<2x32xf32>
    %10 = vector.extract_strided_slice %8 {offsets = [0, 0], sizes = [2, 32], strides = [1, 1]} : vector<2x96xf32> to vector<2x32xf32>
    %11 = arith.addf %9, %10 : vector<2x32xf32>
    %12 = arith.negf %11 : vector<2x32xf32>
    %13 = math.exp %12 : vector<2x32xf32>
    %cst_9 = arith.constant 1.000000e+00 : f32
    %14 = vector.broadcast %cst_9 : f32 to vector<2x32xf32>
    %15 = arith.addf %14, %13 : vector<2x32xf32>
    %16 = arith.divf %14, %15 : vector<2x32xf32>
    %17 = vector.extract_strided_slice %5 {offsets = [0, 32], sizes = [2, 32], strides = [1, 1]} : vector<2x96xf32> to vector<2x32xf32>
    %18 = vector.extract_strided_slice %8 {offsets = [0, 32], sizes = [2, 32], strides = [1, 1]} : vector<2x96xf32> to vector<2x32xf32>
    %19 = arith.addf %17, %18 : vector<2x32xf32>
    %20 = arith.negf %19 : vector<2x32xf32>
    %21 = math.exp %20 : vector<2x32xf32>
    %cst_10 = arith.constant 1.000000e+00 : f32
    %22 = vector.broadcast %cst_10 : f32 to vector<2x32xf32>
    %23 = arith.addf %22, %21 : vector<2x32xf32>
    %24 = arith.divf %22, %23 : vector<2x32xf32>
    %25 = vector.extract_strided_slice %5 {offsets = [0, 64], sizes = [2, 32], strides = [1, 1]} : vector<2x96xf32> to vector<2x32xf32>
    %26 = vector.extract_strided_slice %8 {offsets = [0, 64], sizes = [2, 32], strides = [1, 1]} : vector<2x96xf32> to vector<2x32xf32>
    %27 = arith.mulf %16, %26 : vector<2x32xf32>
    %28 = arith.addf %25, %27 : vector<2x32xf32>
    %29 = math.tanh %28 : vector<2x32xf32>
    %cst_11 = arith.constant 1.000000e+00 : f32
    %30 = vector.broadcast %cst_11 : f32 to vector<2x32xf32>
    %31 = arith.subf %30, %24 : vector<2x32xf32>
    %32 = arith.mulf %31, %29 : vector<2x32xf32>
    %33 = arith.mulf %24, %3 : vector<2x32xf32>
    %34 = arith.addf %32, %33 : vector<2x32xf32>
    %c0_12 = arith.constant 0 : index
    %c0_13 = arith.constant 0 : index
    %35 = vector.load %arg5[%c0_12, %c0_13] : memref<2x32xf32, #tpu.memory_space<vmem>>, vector<2x32xf32>
    tpu.vector_store %arg5[%c0_12, %c0_13], %34 {strides = array<i32>} : memref<2x32xf32, #tpu.memory_space<vmem>>, vector<2x32xf32>,
    %c0_14 = arith.constant 0 : index
    %c0_15 = arith.constant 0 : index
    %c0_16 = arith.constant 0 : index
    %c0_17 = arith.constant 0 : index
    %36 = vector.load %arg4[%c0_14, %c0_15, %c0_16, %c0_17] : memref<1x1x2x32xf32, #tpu.memory_space<vmem>>, vector<1x1x2x32xf32>
    %37 = vector.shape_cast %36 : vector<1x1x2x32xf32> to vector<2x32xf32>
    %38 = vector.shape_cast %34 : vector<2x32xf32> to vector<1x1x2x32xf32>
    tpu.vector_store %arg4[%c0_14, %c0_15, %c0_16, %c0_17], %38 {strides = array<i32>} : memref<1x1x2x32xf32, #tpu.memory_space<vmem>>, vector<1x1x2x32xf32>,
    return
  }
  func.func @transform_0(%arg0: i32, %arg1: i32) -> (i32, i32, i32, i32) {
    %c2_i32 = arith.constant 2 : i32
    %0 = arith.muli %c2_i32, %arg1 : i32
    %c7_i32 = arith.constant 7 : i32
    %1 = arith.subi %c7_i32, %0 : i32
    %2 = arith.muli %arg0, %1 : i32
    %3 = arith.addi %arg1, %2 : i32
    %c0_i32 = arith.constant 0 : i32
    %c0_i32_0 = arith.constant 0 : i32
    %c0_i32_1 = arith.constant 0 : i32
    return %arg0, %3, %c0_i32, %c0_i32_0 : i32, i32, i32, i32
  }
  func.func @transform_1(%arg0: i32, %arg1: i32) -> (i32, i32, i32) {
    %c0_i32 = arith.constant 0 : i32
    %c0_i32_0 = arith.constant 0 : i32
    %c0_i32_1 = arith.constant 0 : i32
    return %arg0, %c0_i32, %c0_i32_0 : i32, i32, i32
  }
  func.func @transform_2(%arg0: i32, %arg1: i32) -> (i32, i32, i32, i32) {
    %c2_i32 = arith.constant 2 : i32
    %0 = arith.muli %c2_i32, %arg1 : i32
    %c7_i32 = arith.constant 7 : i32
    %1 = arith.subi %c7_i32, %0 : i32
    %2 = arith.muli %arg0, %1 : i32
    %3 = arith.addi %arg1, %2 : i32
    %c0_i32 = arith.constant 0 : i32
    %c0_i32_0 = arith.constant 0 : i32
    %c0_i32_1 = arith.constant 0 : i32
    return %arg0, %3, %c0_i32, %c0_i32_0 : i32, i32, i32, i32
  }
}

module attributes {stable_mosaic.version = 11 : i64} {
  func.func @_linear_kernel(%arg0: memref<16x16xf32, #tpu.memory_space<vmem>>, %arg1: memref<16x192xf32, #tpu.memory_space<vmem>>, %arg2: memref<1x192xf32, #tpu.memory_space<vmem>>, %arg3: memref<16x192xf32, #tpu.memory_space<vmem>>) attributes {dimension_semantics = [], scalar_prefetch = 0 : i64, scratch_operands = 0 : i64, tpu.core_type = #tpu.core_type<tc>} {
    %c0 = arith.constant 0 : index
    %c0_0 = arith.constant 0 : index
    %0 = vector.load %arg0[%c0, %c0_0] : memref<16x16xf32, #tpu.memory_space<vmem>>, vector<16x16xf32>
    %c0_1 = arith.constant 0 : index
    %c0_2 = arith.constant 0 : index
    %1 = vector.load %arg1[%c0_1, %c0_2] : memref<16x192xf32, #tpu.memory_space<vmem>>, vector<16x192xf32>
    %cst = arith.constant dense<0.000000e+00> : vector<16x192xf32>
    %2 = tpu.matmul %0, %1, %cst {dimension_numbers = #tpu.dot_dimension_numbers<[1], [0], [0], [1], [0, 0, 1, 1], [], []>} : vector<16x16xf32>, vector<16x192xf32>, vector<16x192xf32> -> vector<16x192xf32>
    %c0_3 = arith.constant 0 : index
    %c0_4 = arith.constant 0 : index
    %3 = vector.load %arg2[%c0_3, %c0_4] : memref<1x192xf32, #tpu.memory_space<vmem>>, vector<1x192xf32>
    %4 = vector.broadcast %3 : vector<1x192xf32> to vector<16x192xf32>
    %5 = arith.addf %2, %4 : vector<16x192xf32>
    %c0_5 = arith.constant 0 : index
    %c0_6 = arith.constant 0 : index
    %6 = vector.load %arg3[%c0_5, %c0_6] : memref<16x192xf32, #tpu.memory_space<vmem>>, vector<16x192xf32>
    tpu.vector_store %arg3[%c0_5, %c0_6], %5 {strides = array<i32>} : memref<16x192xf32, #tpu.memory_space<vmem>>, vector<16x192xf32>,
    return
  }
}

module attributes {stable_mosaic.version = 11 : i64} {
  func.func @_linear_kernel(%arg0: memref<16x64xf32, #tpu.memory_space<vmem>>, %arg1: memref<64x32xf32, #tpu.memory_space<vmem>>, %arg2: memref<1x32xf32, #tpu.memory_space<vmem>>, %arg3: memref<16x32xf32, #tpu.memory_space<vmem>>) attributes {dimension_semantics = [], scalar_prefetch = 0 : i64, scratch_operands = 0 : i64, tpu.core_type = #tpu.core_type<tc>} {
    %c0 = arith.constant 0 : index
    %c0_0 = arith.constant 0 : index
    %0 = vector.load %arg0[%c0, %c0_0] : memref<16x64xf32, #tpu.memory_space<vmem>>, vector<16x64xf32>
    %c0_1 = arith.constant 0 : index
    %c0_2 = arith.constant 0 : index
    %1 = vector.load %arg1[%c0_1, %c0_2] : memref<64x32xf32, #tpu.memory_space<vmem>>, vector<64x32xf32>
    %cst = arith.constant dense<0.000000e+00> : vector<16x32xf32>
    %2 = tpu.matmul %0, %1, %cst {dimension_numbers = #tpu.dot_dimension_numbers<[1], [0], [0], [1], [0, 0, 1, 1], [], []>} : vector<16x64xf32>, vector<64x32xf32>, vector<16x32xf32> -> vector<16x32xf32>
    %c0_3 = arith.constant 0 : index
    %c0_4 = arith.constant 0 : index
    %3 = vector.load %arg2[%c0_3, %c0_4] : memref<1x32xf32, #tpu.memory_space<vmem>>, vector<1x32xf32>
    %4 = vector.broadcast %3 : vector<1x32xf32> to vector<16x32xf32>
    %5 = arith.addf %2, %4 : vector<16x32xf32>
    %c0_5 = arith.constant 0 : index
    %c0_6 = arith.constant 0 : index
    %6 = vector.load %arg3[%c0_5, %c0_6] : memref<16x32xf32, #tpu.memory_space<vmem>>, vector<16x32xf32>
    tpu.vector_store %arg3[%c0_5, %c0_6], %5 {strides = array<i32>} : memref<16x32xf32, #tpu.memory_space<vmem>>, vector<16x32xf32>,
    return
  }
}

module attributes {stable_mosaic.version = 11 : i64} {
  func.func @_linear_kernel(%arg0: memref<2x64xf32, #tpu.memory_space<vmem>>, %arg1: memref<64x32xf32, #tpu.memory_space<vmem>>, %arg2: memref<1x32xf32, #tpu.memory_space<vmem>>, %arg3: memref<2x32xf32, #tpu.memory_space<vmem>>) attributes {dimension_semantics = [], scalar_prefetch = 0 : i64, scratch_operands = 0 : i64, tpu.core_type = #tpu.core_type<tc>} {
    %c0 = arith.constant 0 : index
    %c0_0 = arith.constant 0 : index
    %0 = vector.load %arg0[%c0, %c0_0] : memref<2x64xf32, #tpu.memory_space<vmem>>, vector<2x64xf32>
    %c0_1 = arith.constant 0 : index
    %c0_2 = arith.constant 0 : index
    %1 = vector.load %arg1[%c0_1, %c0_2] : memref<64x32xf32, #tpu.memory_space<vmem>>, vector<64x32xf32>
    %cst = arith.constant dense<0.000000e+00> : vector<2x32xf32>
    %2 = tpu.matmul %0, %1, %cst {dimension_numbers = #tpu.dot_dimension_numbers<[1], [0], [0], [1], [0, 0, 1, 1], [], []>} : vector<2x64xf32>, vector<64x32xf32>, vector<2x32xf32> -> vector<2x32xf32>
    %c0_3 = arith.constant 0 : index
    %c0_4 = arith.constant 0 : index
    %3 = vector.load %arg2[%c0_3, %c0_4] : memref<1x32xf32, #tpu.memory_space<vmem>>, vector<1x32xf32>
    %4 = vector.broadcast %3 : vector<1x32xf32> to vector<2x32xf32>
    %5 = arith.addf %2, %4 : vector<2x32xf32>
    %c0_5 = arith.constant 0 : index
    %c0_6 = arith.constant 0 : index
    %6 = vector.load %arg3[%c0_5, %c0_6] : memref<2x32xf32, #tpu.memory_space<vmem>>, vector<2x32xf32>
    tpu.vector_store %arg3[%c0_5, %c0_6], %5 {strides = array<i32>} : memref<2x32xf32, #tpu.memory_space<vmem>>, vector<2x32xf32>,
    return
  }
}

module attributes {stable_mosaic.version = 11 : i64} {
  func.func @kernel(%arg0: memref<2x16xf32, #tpu.memory_space<vmem>>, %arg1: memref<2x32xf32, #tpu.memory_space<vmem>>, %arg2: memref<2x8x64xf32, #tpu.memory_space<vmem>>, %arg3: memref<2x8x32xf32, #tpu.memory_space<vmem>>, %arg4: memref<32x32xf32, #tpu.memory_space<vmem>>, %arg5: memref<1x32xf32, #tpu.memory_space<vmem>>, %arg6: memref<16x96xf32, #tpu.memory_space<vmem>>, %arg7: memref<64x96xf32, #tpu.memory_space<vmem>>, %arg8: memref<32x96xf32, #tpu.memory_space<vmem>>, %arg9: memref<1x96xf32, #tpu.memory_space<vmem>>, %arg10: memref<32x128xf32, #tpu.memory_space<vmem>>, %arg11: memref<64x128xf32, #tpu.memory_space<vmem>>, %arg12: memref<16x128xf32, #tpu.memory_space<vmem>>, %arg13: memref<1x128xf32, #tpu.memory_space<vmem>>, %arg14: memref<2x128xf32, #tpu.memory_space<vmem>>, %arg15: memref<2x32xf32, #tpu.memory_space<vmem>>, %arg16: memref<2x1xi32, #tpu.memory_space<vmem>>) attributes {dimension_semantics = [], scalar_prefetch = 0 : i64, scratch_operands = 0 : i64, tpu.core_type = #tpu.core_type<tc>} {
    %c0 = arith.constant 0 : index
    %c0_0 = arith.constant 0 : index
    %0 = vector.load %arg0[%c0, %c0_0] : memref<2x16xf32, #tpu.memory_space<vmem>>, vector<2x16xf32>
    %c0_1 = arith.constant 0 : index
    %c0_2 = arith.constant 0 : index
    %1 = vector.load %arg1[%c0_1, %c0_2] : memref<2x32xf32, #tpu.memory_space<vmem>>, vector<2x32xf32>
    %c0_3 = arith.constant 0 : index
    %c0_4 = arith.constant 0 : index
    %c0_5 = arith.constant 0 : index
    %2 = vector.load %arg2[%c0_3, %c0_4, %c0_5] : memref<2x8x64xf32, #tpu.memory_space<vmem>>, vector<2x8x64xf32>
    %c0_6 = arith.constant 0 : index
    %c0_7 = arith.constant 0 : index
    %c0_8 = arith.constant 0 : index
    %3 = vector.load %arg3[%c0_6, %c0_7, %c0_8] : memref<2x8x32xf32, #tpu.memory_space<vmem>>, vector<2x8x32xf32>
    %c0_9 = arith.constant 0 : index
    %c0_10 = arith.constant 0 : index
    %4 = vector.load %arg4[%c0_9, %c0_10] : memref<32x32xf32, #tpu.memory_space<vmem>>, vector<32x32xf32>
    %cst = arith.constant dense<0.000000e+00> : vector<2x32xf32>
    %5 = tpu.matmul %1, %4, %cst {dimension_numbers = #tpu.dot_dimension_numbers<[1], [0], [0], [1], [0, 0, 1, 1], [], []>} : vector<2x32xf32>, vector<32x32xf32>, vector<2x32xf32> -> vector<2x32xf32>
    %6 = vector.shape_cast %5 : vector<2x32xf32> to vector<2x1x32xf32>
    %7 = vector.broadcast %6 : vector<2x1x32xf32> to vector<2x8x32xf32>
    %8 = arith.addf %3, %7 : vector<2x8x32xf32>
    %9 = math.tanh %8 : vector<2x8x32xf32>
    %c0_11 = arith.constant 0 : index
    %c0_12 = arith.constant 0 : index
    %10 = vector.load %arg5[%c0_11, %c0_12] : memref<1x32xf32, #tpu.memory_space<vmem>>, vector<1x32xf32>
    %11 = vector.shape_cast %10 : vector<1x32xf32> to vector<1x1x32xf32>
    %12 = vector.broadcast %11 : vector<1x1x32xf32> to vector<2x8x32xf32>
    %13 = arith.mulf %9, %12 : vector<2x8x32xf32>
    %cst_13 = arith.constant dense<0.000000e+00> : vector<2x8xf32>
    %14 = vector.multi_reduction <add>, %13, %cst_13 [2] : vector<2x8x32xf32> to vector<2x8xf32>
    %cst_14 = arith.constant dense<0xFF800000> : vector<2xf32>
    %15 = vector.multi_reduction <maximumf>, %14, %cst_14 [1] : vector<2x8xf32> to vector<2xf32>
    %16 = vector.shape_cast %15 : vector<2xf32> to vector<2x1xf32>
    %17 = vector.broadcast %16 : vector<2x1xf32> to vector<2x8xf32>
    %18 = arith.subf %14, %17 : vector<2x8xf32>
    %19 = math.exp %18 : vector<2x8xf32>
    %cst_15 = arith.constant dense<0.000000e+00> : vector<2xf32>
    %20 = vector.multi_reduction <add>, %19, %cst_15 [1] : vector<2x8xf32> to vector<2xf32>
    %21 = vector.shape_cast %20 : vector<2xf32> to vector<2x1xf32>
    %22 = vector.broadcast %21 : vector<2x1xf32> to vector<2x8xf32>
    %23 = arith.divf %19, %22 : vector<2x8xf32>
    %24 = vector.shape_cast %23 : vector<2x8xf32> to vector<2x1x8xf32>
    "tpu.trace_start"() <{level = 10 : i32, message = "bqs,bse->bqe"}> : () -> ()
    %cst_16 = arith.constant dense<0.000000e+00> : vector<2x1x64xf32>
    %25 = tpu.matmul %24, %2, %cst_16 {dimension_numbers = #tpu.dot_dimension_numbers<[2], [1], [1], [2], [0, 0, 0, 1, 1, 2], [0], [0]>} : vector<2x1x8xf32>, vector<2x8x64xf32>, vector<2x1x64xf32> -> vector<2x1x64xf32>
    "tpu.trace_stop"() : () -> ()
    %26 = vector.shape_cast %25 : vector<2x1x64xf32> to vector<2x64xf32>
    %c0_17 = arith.constant 0 : index
    %c0_18 = arith.constant 0 : index
    %27 = vector.load %arg6[%c0_17, %c0_18] : memref<16x96xf32, #tpu.memory_space<vmem>>, vector<16x96xf32>
    %cst_19 = arith.constant dense<0.000000e+00> : vector<2x96xf32>
    %28 = tpu.matmul %0, %27, %cst_19 {dimension_numbers = #tpu.dot_dimension_numbers<[1], [0], [0], [1], [0, 0, 1, 1], [], []>} : vector<2x16xf32>, vector<16x96xf32>, vector<2x96xf32> -> vector<2x96xf32>
    %c0_20 = arith.constant 0 : index
    %c0_21 = arith.constant 0 : index
    %29 = vector.load %arg7[%c0_20, %c0_21] : memref<64x96xf32, #tpu.memory_space<vmem>>, vector<64x96xf32>
    %cst_22 = arith.constant dense<0.000000e+00> : vector<2x96xf32>
    %30 = tpu.matmul %26, %29, %cst_22 {dimension_numbers = #tpu.dot_dimension_numbers<[1], [0], [0], [1], [0, 0, 1, 1], [], []>} : vector<2x64xf32>, vector<64x96xf32>, vector<2x96xf32> -> vector<2x96xf32>
    %31 = arith.addf %28, %30 : vector<2x96xf32>
    %c0_23 = arith.constant 0 : index
    %c0_24 = arith.constant 0 : index
    %32 = vector.load %arg9[%c0_23, %c0_24] : memref<1x96xf32, #tpu.memory_space<vmem>>, vector<1x96xf32>
    %33 = vector.broadcast %32 : vector<1x96xf32> to vector<2x96xf32>
    %34 = arith.addf %31, %33 : vector<2x96xf32>
    %c0_25 = arith.constant 0 : index
    %c0_26 = arith.constant 0 : index
    %35 = vector.load %arg8[%c0_25, %c0_26] : memref<32x96xf32, #tpu.memory_space<vmem>>, vector<32x96xf32>
    %cst_27 = arith.constant dense<0.000000e+00> : vector<2x96xf32>
    %36 = tpu.matmul %1, %35, %cst_27 {dimension_numbers = #tpu.dot_dimension_numbers<[1], [0], [0], [1], [0, 0, 1, 1], [], []>} : vector<2x32xf32>, vector<32x96xf32>, vector<2x96xf32> -> vector<2x96xf32>
    %37 = vector.extract_strided_slice %34 {offsets = [0, 0], sizes = [2, 32], strides = [1, 1]} : vector<2x96xf32> to vector<2x32xf32>
    %38 = vector.extract_strided_slice %36 {offsets = [0, 0], sizes = [2, 32], strides = [1, 1]} : vector<2x96xf32> to vector<2x32xf32>
    %39 = arith.addf %37, %38 : vector<2x32xf32>
    %40 = arith.negf %39 : vector<2x32xf32>
    %41 = math.exp %40 : vector<2x32xf32>
    %cst_28 = arith.constant 1.000000e+00 : f32
    %42 = vector.broadcast %cst_28 : f32 to vector<2x32xf32>
    %43 = arith.addf %42, %41 : vector<2x32xf32>
    %44 = arith.divf %42, %43 : vector<2x32xf32>
    %45 = vector.extract_strided_slice %34 {offsets = [0, 32], sizes = [2, 32], strides = [1, 1]} : vector<2x96xf32> to vector<2x32xf32>
    %46 = vector.extract_strided_slice %36 {offsets = [0, 32], sizes = [2, 32], strides = [1, 1]} : vector<2x96xf32> to vector<2x32xf32>
    %47 = arith.addf %45, %46 : vector<2x32xf32>
    %48 = arith.negf %47 : vector<2x32xf32>
    %49 = math.exp %48 : vector<2x32xf32>
    %cst_29 = arith.constant 1.000000e+00 : f32
    %50 = vector.broadcast %cst_29 : f32 to vector<2x32xf32>
    %51 = arith.addf %50, %49 : vector<2x32xf32>
    %52 = arith.divf %50, %51 : vector<2x32xf32>
    %53 = vector.extract_strided_slice %34 {offsets = [0, 64], sizes = [2, 32], strides = [1, 1]} : vector<2x96xf32> to vector<2x32xf32>
    %54 = vector.extract_strided_slice %36 {offsets = [0, 64], sizes = [2, 32], strides = [1, 1]} : vector<2x96xf32> to vector<2x32xf32>
    %55 = arith.mulf %44, %54 : vector<2x32xf32>
    %56 = arith.addf %53, %55 : vector<2x32xf32>
    %57 = math.tanh %56 : vector<2x32xf32>
    %cst_30 = arith.constant 1.000000e+00 : f32
    %58 = vector.broadcast %cst_30 : f32 to vector<2x32xf32>
    %59 = arith.subf %58, %52 : vector<2x32xf32>
    %60 = arith.mulf %59, %57 : vector<2x32xf32>
    %61 = arith.mulf %52, %1 : vector<2x32xf32>
    %62 = arith.addf %60, %61 : vector<2x32xf32>
    %c0_31 = arith.constant 0 : index
    %c0_32 = arith.constant 0 : index
    %63 = vector.load %arg15[%c0_31, %c0_32] : memref<2x32xf32, #tpu.memory_space<vmem>>, vector<2x32xf32>
    tpu.vector_store %arg15[%c0_31, %c0_32], %62 {strides = array<i32>} : memref<2x32xf32, #tpu.memory_space<vmem>>, vector<2x32xf32>,
    %c0_33 = arith.constant 0 : index
    %c0_34 = arith.constant 0 : index
    %64 = vector.load %arg10[%c0_33, %c0_34] : memref<32x128xf32, #tpu.memory_space<vmem>>, vector<32x128xf32>
    %cst_35 = arith.constant dense<0.000000e+00> : vector<2x128xf32>
    %65 = tpu.matmul %62, %64, %cst_35 {dimension_numbers = #tpu.dot_dimension_numbers<[1], [0], [0], [1], [0, 0, 1, 1], [], []>} : vector<2x32xf32>, vector<32x128xf32>, vector<2x128xf32> -> vector<2x128xf32>
    %c0_36 = arith.constant 0 : index
    %c0_37 = arith.constant 0 : index
    %66 = vector.load %arg11[%c0_36, %c0_37] : memref<64x128xf32, #tpu.memory_space<vmem>>, vector<64x128xf32>
    %cst_38 = arith.constant dense<0.000000e+00> : vector<2x128xf32>
    %67 = tpu.matmul %26, %66, %cst_38 {dimension_numbers = #tpu.dot_dimension_numbers<[1], [0], [0], [1], [0, 0, 1, 1], [], []>} : vector<2x64xf32>, vector<64x128xf32>, vector<2x128xf32> -> vector<2x128xf32>
    %68 = arith.addf %65, %67 : vector<2x128xf32>
    %c0_39 = arith.constant 0 : index
    %c0_40 = arith.constant 0 : index
    %69 = vector.load %arg12[%c0_39, %c0_40] : memref<16x128xf32, #tpu.memory_space<vmem>>, vector<16x128xf32>
    %cst_41 = arith.constant dense<0.000000e+00> : vector<2x128xf32>
    %70 = tpu.matmul %0, %69, %cst_41 {dimension_numbers = #tpu.dot_dimension_numbers<[1], [0], [0], [1], [0, 0, 1, 1], [], []>} : vector<2x16xf32>, vector<16x128xf32>, vector<2x128xf32> -> vector<2x128xf32>
    %71 = arith.addf %68, %70 : vector<2x128xf32>
    %c0_42 = arith.constant 0 : index
    %c0_43 = arith.constant 0 : index
    %72 = vector.load %arg13[%c0_42, %c0_43] : memref<1x128xf32, #tpu.memory_space<vmem>>, vector<1x128xf32>
    %73 = vector.broadcast %72 : vector<1x128xf32> to vector<2x128xf32>
    %74 = arith.addf %71, %73 : vector<2x128xf32>
    %c0_44 = arith.constant 0 : index
    %c0_45 = arith.constant 0 : index
    %75 = vector.load %arg14[%c0_44, %c0_45] : memref<2x128xf32, #tpu.memory_space<vmem>>, vector<2x128xf32>
    tpu.vector_store %arg14[%c0_44, %c0_45], %74 {strides = array<i32>} : memref<2x128xf32, #tpu.memory_space<vmem>>, vector<2x128xf32>,
    %76 = tpu.iota {dimensions = array<i32: 1>} : vector<2x128xi32>
    %c24_i32 = arith.constant 24 : i32
    %77 = vector.broadcast %c24_i32 : i32 to vector<2x128xi32>
    %78 = arith.cmpi slt, %76, %77 : vector<2x128xi32>
    %cst_46 = arith.constant 0xFF800000 : f32
    %79 = vector.broadcast %cst_46 : f32 to vector<2x128xf32>
    %80 = arith.select %78, %74, %79 : vector<2x128xi1>, vector<2x128xf32>
    %cst_47 = arith.constant dense<0xFF800000> : vector<2xf32>
    %81 = vector.multi_reduction <maximumf>, %80, %cst_47 [1] : vector<2x128xf32> to vector<2xf32>
    %82 = vector.shape_cast %81 : vector<2xf32> to vector<2x1xf32>
    %83 = vector.broadcast %82 : vector<2x1xf32> to vector<2x128xf32>
    %84 = arith.cmpf oge, %80, %83 : vector<2x128xf32>
    %c128_i32 = arith.constant 128 : i32
    %85 = vector.broadcast %c128_i32 : i32 to vector<2x128xi32>
    %86 = arith.select %84, %76, %85 : vector<2x128xi1>, vector<2x128xi32>
    %cst_48 = arith.constant dense<2147483647> : vector<2xi32>
    %87 = vector.multi_reduction <minsi>, %86, %cst_48 [1] : vector<2x128xi32> to vector<2xi32>
    %88 = vector.shape_cast %87 : vector<2xi32> to vector<2x1xi32>
    %c0_49 = arith.constant 0 : index
    %c0_50 = arith.constant 0 : index
    %89 = vector.load %arg16[%c0_49, %c0_50] : memref<2x1xi32, #tpu.memory_space<vmem>>, vector<2x1xi32>
    tpu.vector_store %arg16[%c0_49, %c0_50], %88 {strides = array<i32>} : memref<2x1xi32, #tpu.memory_space<vmem>>, vector<2x1xi32>,
    return
  }
}

</mosaic_0001>

<bundles_post_ra>
// kernel: forward.7
= control target key start
LH: loop header
LB: loop body
LE: loop exit
PB: predicated region body
PF: predicated region fallthrough
CT: control target
= control target key end

     0   :  { %vm31_vm0 = vcmask 523264   ;;  %vm113_vm1 = vcmask 261120   ;;  %s213_s1 = inlined_call_operand.vmem [shape: f32[64,32], index: 1, kind: input, shape index: {}]   ;;  %s214_s0 = inlined_call_operand.vmem [shape: f32[16,64], index: 0, kind: input, shape index: {}]   ;;  %s215_s2 = inlined_call_operand.vmem [shape: f32[1,32], index: 2, kind: input, shape index: {}]   ;;  %s216_s3 = inlined_call_operand.vmem [shape: f32[16,32], index: 3, kind: output, shape index: {}]  }
   0x1   :  { %v23_v0 = vld [vmem:[%s213_s1 + $0x38] sm:$0xff]  ;;  %v22_v1 = vld [vmem:[%s213_s1 + $0x30] sm:$0xff]  ;;  %v21_v2 = vld [vmem:[%s213_s1 + $0x28] sm:$0xff] }
   0x2   :  { %133 = vmatprep.subr.mxu0 %v23_v0  ;;  %v14_v3 = vld [vmem:[%s214_s0] sm:$0xff]  ;;  %v19_v5 = vld [vmem:[%s213_s1 + $0x18] sm:$0xff]  ;;  %v18_v6 = vld [vmem:[%s213_s1 + $0x10] sm:$0xff] }
   0x3   :  { %134 = vmatpush3.msra.mxu0 %v23_v0  ;;  %149 = vmatprep.mubr.msk.f32.mxu0 %vm31_vm0, %v14_v3  ;;  %v20_v4 = vld [vmem:[%s213_s1 + $0x20] sm:$0xff]  ;;  %v17_v7 = vld [vmem:[%s213_s1 + $0x8] sm:$0xff] }
   0x4   :  { %135 = vmatprep.subr.mxu0 %v22_v1  ;;  %v16_v8 = vld [vmem:[%s213_s1] sm:$0xff]  ;;  %v15_v9 = vld [vmem:[%s214_s0 + $0x8] sm:$0xff] }
   0x5   :  { %136 = vmatpush3.msra.mxu0 %v22_v1  ;;  %v120_v10 = vld [vmem:[%s215_s2] ss:$0 sm:$0xff] }
   0x6   :  { %137 = vmatprep.subr.mxu0 %v21_v2 }
   0x7   :  { %138 = vmatpush3.msra.mxu0 %v21_v2 }
   0x8   :  { %139 = vmatprep.subr.mxu0 %v20_v4 }
   0x9   :  { %140 = vmatpush3.msra.mxu0 %v20_v4 }
   0xa   :  { %141 = vmatprep.subr.mxu0 %v19_v5 }
   0xb   :  { %142 = vmatpush3.msra.mxu0 %v19_v5 }
   0xc   :  { %143 = vmatprep.subr.mxu0 %v18_v6 }
   0xd   :  { %144 = vmatpush3.msra.mxu0 %v18_v6 }
   0xe   :  { %145 = vmatprep.subr.mxu0 %v17_v7 }
   0xf   :  { %146 = vmatpush3.msra.mxu0 %v17_v7 }
  0x10   :  { %147 = vmatprep.subr.mxu0 %v16_v8 }
  0x11   :  { %148 = vmatpush3.msra.mxu0 %v16_v8 }
  0x12   :  { %150 = vmatmul.mubr.msk.f32.vlgmr.msra.gmra.mxu0 %vm31_vm0, %v15_v9 }
  0xd2   :  { %v151_v11 = vpop.f32.mrf.mxu0 }
  0xd3   :  { %v110_v12 = vadd.f32 %v151_v11, %v120_v10 }
  0xd4   :  { %v104_v13 = vpop.f32.mrf.mxu0 }
  0xd5   :  { %115 = vst.msk [vmem:[%s216_s3 + $0x8] sm:$0xff] %vm113_vm1, %v110_v12  ;;  %v105_v14 = vadd.f32 %v120_v10, %v104_v13 }
  0xd7   :  { %114 = vst.msk [vmem:[%s216_s3] sm:$0xff] %vm113_vm1, %v105_v14 }

// kernel: forward.4
= control target key start
LH: loop header
LB: loop body
LE: loop exit
PB: predicated region body
PF: predicated region fallthrough
CT: control target
= control target key end

     0   :  { %v132_v3 = vmov 0.0   ;;  %vm32_vm0 = vcmask 130048   ;;  %v22_v7 = vlaneseq  ;;  %vm117_vm1 = vcmask 523264   ;;  %s186_s1 = inlined_call_operand.vmem [shape: f32[16,192], index: 1, kind: input, shape index: {}]   ;;  %s187_s0 = inlined_call_operand.vmem [shape: f32[16,16], index: 0, kind: input, shape index: {}]   ;;  %s188_s2 = inlined_call_operand.vmem [shape: f32[1,192], index: 2, kind: input, shape index: {}]   ;;  %s189_s3 = inlined_call_operand.vmem [shape: f32[16,192], index: 3, kind: output, shape index: {}]  }
   0x1   :  { %v19_v0 = vld [vmem:[%s186_s1 + $0x18] sm:$0xff]  ;;  %v18_v1 = vld [vmem:[%s186_s1 + $0x10] sm:$0xff]  ;;  %v17_v2 = vld [vmem:[%s186_s1 + $0x8] sm:$0xff]  ;;  %103 = vmatprep.mubr.f32.mxu0 %v132_v3  ;;  %109 = vmatprep.mubr.f32.mxu1 %v132_v3 }
   0x2   :  { %67 = vmatprep.subr.mxu0 %v19_v0  ;;  %127 = vmatprep.subr.mxu1 %v19_v0  ;;  %v16_v4 = vld [vmem:[%s186_s1] sm:$0xff]  ;;  %v15_v6 = vld [vmem:[%s187_s0 + $0x8] sm:$0xff]  ;;  %v23_v8 = vshrl.u32 %v22_v7, 7 }
   0x3   :  { %68 = vmatpush1.msra.mxu0 %v18_v1  ;;  %129 = vmatpush1.msra.mxu1 %v18_v1  ;;  %v14_v5 = vld [vmem:[%s187_s0] sm:$0xff] }
   0x4   :  { %69 = vmatprep.subr.mxu0 %v17_v2  ;;  %128 = vmatprep.subr.mxu1 %v17_v2  ;;  %v24_v9 = vsub.s32 0, %v23_v8  ;;  %v20_v10 = vld [vmem:[%s188_s2] sm:$0x3]  ;;  %v28_v11 = vsub.s32 1, %v23_v8 }
   0x5   :  { %70 = vmatpush1.msra.mxu0 %v16_v4  ;;  %130 = vmatpush1.msra.mxu1 %v16_v4 }
   0x6   :  { %125 = vmatmul.mubr.msk.f32.vlgmr.msra.gmra.mxu0 %vm32_vm0, %v14_v5  ;;  %126 = vmatmul.mubr.msk.f32.vlgmr.msra.gmra.mxu1 %vm32_vm0, %v15_v6  ;;  %v25_v12 = vrot.slane %v20_v10, %v24_v9  ;;  %v29_v13 = vrot.slane %v20_v10, %v28_v11 }
  0xc6   :  { %v105_v14 = vpop.f32.mrf.mxu0  ;;  %v111_v15 = vpop.f32.mrf.mxu1 }
  0xc7   :  { %v106_v16 = vadd.f32 %v105_v14, %v25_v12  ;;  %v112_v17 = vadd.f32 %v111_v15, %v25_v12 }
  0xc8   :  { %v107_v18 = vpop.f32.mrf.mxu0  ;;  %v113_v19 = vpop.f32.mrf.mxu1 }
  0xc9   :  { %116 = vst [vmem:[%s189_s3] sm:$0xff] %v106_v16  ;;  %119 = vst [vmem:[%s189_s3 + $0x10] sm:$0xff] %v112_v17  ;;  %v108_v20 = vadd.f32 %v107_v18, %v29_v13  ;;  %v114_v21 = vadd.f32 %v113_v19, %v29_v13 }
  0xcb   :  { %118 = vst.msk [vmem:[%s189_s3 + $0x8] sm:$0xff] %vm117_vm1, %v108_v20  ;;  %120 = vst.msk [vmem:[%s189_s3 + $0x18] sm:$0xff] %vm117_vm1, %v114_v21 }

// kernel: forward.5
= control target key start
LH: loop header
LB: loop body
LE: loop exit
PB: predicated region body
PF: predicated region fallthrough
CT: control target
= control target key end

     0   :  { %s628_s9 = smov 0   ;;  %s630_s10 = smov 0   ;;  %s690_s0 = inlined_call_operand.vmem [shape: f32[2,8,2,96], index: 0, kind: input, shape index: {}]   ;;  %s691_s1 = inlined_call_operand.vmem [shape: f32[2,32,96], index: 1, kind: input, shape index: {}]   ;;  %s692_s2 = inlined_call_operand.vmem [shape: f32[2,8,2,32], index: 2, kind: output, shape index: {}]  }
   0x1   :  { %s632_s11 = smov 0   ;;  %s634_s12 = smov 0  }
   0x2   :  { %s636_s13 = smov 0  }
   0x3 LB: > { %s21_s14 = sadd.s32 1, %s597_s11  ;;  %s24_s15 = sadd.s32 1, %s601_s12  ;;  %s605_s13 = sphi %s636_s13, %s12_s13   ;;  %s601_s12 = sphi %s634_s12, %s696_s12   ;;  %s597_s11 = sphi %s632_s11, %s695_s11   ;;  %s593_s10 = sphi %s630_s10, %s694_s10   ;;  %s589_s9 = sphi %s628_s9, %s693_s9  }
   0x4   : > { %p22_p0 = scmp.ge.s32.totalorder %s21_s14, 8  ;;  %p484_p1 = scmp.ge.s32.totalorder %s605_s13, 1 }
   0x5   : > { %p165_p2 = scmp.lt.s32.totalorder %s605_s13, 17 }
   0x6   : > { %s698_s14 = smov (%p22_p0, %s21_s14), 0  ;;  %s700_s15 = smov (!%p22_p0, %s24_s15), %s601_s12 }
   0x7   : > { %p166_p3 = pnand %p484_p1, %p165_p2  ;;  %p26_p4 = scmp.ge.s32.totalorder %s700_s15, 2 }
   0x8   : > { %s485_s16 = sshll.u32 (!%p166_p3), %s589_s9, 1  ;;  %p210_p5 = scmp.lt.s32.totalorder (!%p166_p3), %s593_s10, 1 }
   0x9   : > { %s702_s15 = smov (%p26_p4, %s700_s15), 0  ;;  %169 = sbr.rel (%p166_p3) target bundleno = 713 (0x2c9), region = 28 }
   0xa   : > { %s207_s17 = ssub.s32 (!%p166_p3), 7, %s485_s16  ;;  %p493_p7 = scmp.ne.s32.totalorder (!%p166_p3), %s589_s9, 0 }
   0xb   : > { %s208_s18 = smul.u32 (!%p166_p3), %s593_s10, %s207_s17 }
   0xd   : > { %s209_s19 = sadd.s32 (!%p166_p3), %s589_s9, %s208_s18 }
   0xe   : > { %s704_s10 = smov (!%p210_p5, %s593_s10), 1  ;;  %p212_p6 = scmp.lt.s32.totalorder %s209_s19, 7 }
   0xf   : > { %s486_s20 = sshll.u32 %s704_s10, 3  ;;  %s498_s21 = sshll.u32 %s704_s10, 5 }
  0x10   : > { %s706_s19 = smov (!%p212_p6, %s209_s19), 7  ;;  %s226_s24 = scalar_lea.vmem %s691_s1, %s498_s21 }
  0x11   : > { %s215_s25 = sadd.s32 %s486_s20, %s706_s19  ;;  %246 = sbr.rel (%p493_p7) target bundleno = 24 (0x18), region = 32 }
  0x12   : > { %s487_s26 = sshll.u32 %s215_s25, 1 }
  0x13   : > { %s217_s29 = scalar_lea.vmem %s690_s0, %s487_s26  ;;  %s671_s4 = scalar_lea.vmem %s692_s2, %s487_s26 }
  0x16   : > { %vm247_vm0 = vcmask 254976   ;;  %v607_v0 = vmov 0.0  }
  0x17   : > { %248 = vst.msk [vmem:[#allocation2] sm:$0x3] %vm247_vm0, %v607_v0 }
  0x18 PF: > { %v254_v1 = vld [vmem:[%s226_s24 + $0x18] sm:$0xff]  ;;  %v608_v2 = vmov 0.0   ;;  %v253_v3 = vld [vmem:[%s226_s24 + $0x10] sm:$0xff]  ;;  %vm609_vm1 = vmmov 0   ;;  %v252_v4 = vld [vmem:[%s226_s24 + $0x8] sm:$0xff]  ;;  %vm255_vm2 = vcmask 261120  }
  0x19   : > { %504 = vmatprep.subr.mxu0 %v608_v2  ;;  %512 = vmatprep.mubr.msk.f32.mxu0 %vm609_vm1, %v608_v2  ;;  %v251_v5 = vld [vmem:[%s226_s24] sm:$0xff]  ;;  %s610_s5 = smov 64   ;;  %s611_s6 = smov 96   ;;  %vm362_vm3 = vcmask 254976  }
  0x1a   : > { %505 = vmatpush3.msra.mxu0 %v254_v1  ;;  %v250_v9 = vld [vmem:[%s217_s29] sm:$0x3]  ;;  %s612_s7 = smov 32  }
  0x1b   : > { %506 = vmatprep.subr.mxu0 %v608_v2 }
  0x1c   : > { %507 = vmatpush3.msra.mxu0 %v253_v3 }
  0x1d   : > { %508 = vmatprep.subr.mxu0 %v608_v2 }
  0x1e   : > { %509 = vmatpush3.msra.mxu0 %v252_v4  ;;  %v249_v6 = vld [vmem:[#allocation2] sm:$0x3] }
  0x1f   : > { %510 = vmatprep.subr.mxu0 %v608_v2 }
  0x20   : > { %511 = vmatpush3.msra.mxu0 %v251_v5 }
  0x21   : > { %513 = vmatmul.mubr.msk.f32.vlgmr.msra.gmra.mxu0 %vm255_vm2, %v249_v6 }
  0xe1   : > { %v325_v7 = vpop.f32.mrf.mxu0 }
  0xe2   : > { %337 = vrot.lane.b32.xlu0 %v325_v7, %s610_s5  ;;  %v329_v10 = vadd.f32 %v325_v7, %v250_v9 }
  0xe3   : > { %v514_v8 = vpop.f32.mrf.mxu0 }
  0xe4   : > { %v495_v11 = vmul.f32 -1.442695, %v329_v10 }
  0xe6   : > { %561 = vpow2.f32 %v495_v11 }
  0xf3   : > { %v562_v12 = vpop.eup %561 }
  0xf4   : > { %v333_v13 = vadd.f32 1.0, %v562_v12 }
  0xf6   : > { %563 = vrcp.f32 %v333_v13 }
 0x103   : > { %v564_v14 = vpop.eup %563 }
 0x104   : > { %v347_v21 = vsub.f32 1.0, %v564_v14 }
 0x154   : > { %v338_v15 = vpop.permute.xlu0 %337 }
 0x155   : > { %v340_v16 = vmul.f32 %v564_v14, %v338_v15 }
 0x157   : > { %342 = vrot.lane.b32.xlu0 %v340_v16, %s610_s5 }
 0x1c9   : > { %v343_v17 = vpop.permute.xlu0 %342 }
 0x1ca   : > { %v345_v18 = vadd.f32 %v343_v17, %v250_v9 }
 0x1cc   : > { %565 = vtanh.f32 %v345_v18 }
 0x1d9   : > { %v566_v19 = vpop.eup %565 }
 0x1da   : > { %349 = vrot.lane.b32.xlu1 %v566_v19, %s611_s6 }
 0x1de   : > { %353 = vrot.lane.b32.xlu1 %v249_v6, %s612_s7 }
 0x24c   : > { %v350_v20 = vpop.permute.xlu1 %349 }
 0x24d   : > { %v352_v23 = vmul.f32 %v350_v20, %v347_v21 }
 0x250   : > { %v354_v22 = vpop.permute.xlu1 %353 }
 0x251   : > { %v356_v24 = vmul.f32 %v564_v14, %v354_v22 }
 0x253   : > { %v357_v25 = vadd.f32 %v356_v24, %v352_v23 }
 0x255   : > { %359 = vrot.lane.b32.xlu0 %v357_v25, %s611_s6 }
 0x2c7   : > { %v360_v26 = vpop.permute.xlu0 %359 }
 0x2c8   : > { %363 = vst.msk [vmem:[#allocation2] sm:$0x3] %vm362_vm3, %v360_v26  ;;  %364 = vst.msk [vmem:[%s671_s4] sm:$0x3] %vm362_vm3, %v360_v26 }
 0x2c9 PF: > { %s12_s13 = sadd.s32 1, %s605_s13   ;;  %s693_s9 = smov %s597_s11 }
 0x2ca   : > { %p9_p8 = scmp.ge.s32.totalorder %s12_s13, 18   ;;  %s694_s10 = smov %s601_s12 }
 0x2cb   : > { %s695_s11 = smov %s698_s14  ;;  %s696_s12 = smov %s702_s15 }
 0x2cc   :  { %11 = sbr.rel (!%p9_p8) target bundleno = 3 (0x3), region = 65 }

// kernel: custom-call.5
= control target key start
LH: loop header
LB: loop body
LE: loop exit
PB: predicated region body
PF: predicated region fallthrough
CT: control target
= control target key end

     0   :  { %s6_s0 = inlined_call_operand.vmem [shape: f32[5,2,128], index: 0, kind: output, shape index: {}]  }

// kernel: custom-call.6
= control target key start
LH: loop header
LB: loop body
LE: loop exit
PB: predicated region body
PF: predicated region fallthrough
CT: control target
= control target key end

     0   :  { %s6_s0 = inlined_call_operand.vmem [shape: s32[5,2], index: 0, kind: output, shape index: {}]  }

// kernel: custom-call
= control target key start
LH: loop header
LB: loop body
LE: loop exit
PB: predicated region body
PF: predicated region fallthrough
CT: control target
= control target key end

     0   :  { %s6_s0 = inlined_call_operand.vmem [shape: s32[2], index: 0, kind: output, shape index: {}]  }

// kernel: forward.6
= control target key start
LH: loop header
LB: loop body
LE: loop exit
PB: predicated region body
PF: predicated region fallthrough
CT: control target
= control target key end

     0   :  { %v142_v0 = vmov 0.0   ;;  %vm143_vm0 = vmmov 0   ;;  %vm30_vm1 = vcmask 523264   ;;  %vm104_vm2 = vcmask 254976   ;;  %s197_s1 = inlined_call_operand.vmem [shape: f32[64,32], index: 1, kind: input, shape index: {}]   ;;  %s198_s0 = inlined_call_operand.vmem [shape: f32[2,64], index: 0, kind: input, shape index: {}]   ;;  %s199_s2 = inlined_call_operand.vmem [shape: f32[1,32], index: 2, kind: input, shape index: {}]   ;;  %s200_s3 = inlined_call_operand.vmem [shape: f32[2,32], index: 3, kind: output, shape index: {}]  }
   0x1   :  { %121 = vmatprep.subr.mxu0 %v142_v0  ;;  %v22_v1 = vld [vmem:[%s197_s1 + $0x38] sm:$0xff]  ;;  %v21_v2 = vld [vmem:[%s197_s1 + $0x30] sm:$0xff]  ;;  %137 = vmatprep.mubr.msk.f32.mxu0 %vm143_vm0, %v142_v0  ;;  %v20_v3 = vld [vmem:[%s197_s1 + $0x28] sm:$0xff] }
   0x2   :  { %122 = vmatpush3.msra.mxu0 %v22_v1  ;;  %v19_v4 = vld [vmem:[%s197_s1 + $0x20] sm:$0xff]  ;;  %v18_v5 = vld [vmem:[%s197_s1 + $0x18] sm:$0xff]  ;;  %v17_v6 = vld [vmem:[%s197_s1 + $0x10] sm:$0xff] }
   0x3   :  { %123 = vmatprep.subr.mxu0 %v142_v0  ;;  %v16_v7 = vld [vmem:[%s197_s1 + $0x8] sm:$0xff]  ;;  %v15_v8 = vld [vmem:[%s197_s1] sm:$0xff] }
   0x4   :  { %124 = vmatpush3.msra.mxu0 %v21_v2  ;;  %v14_v9 = vld [vmem:[%s198_s0] sm:$0x3] }
   0x5   :  { %125 = vmatprep.subr.mxu0 %v142_v0  ;;  %v110_v10 = vld [vmem:[%s199_s2] ss:$0 sm:$0xff] }
   0x6   :  { %126 = vmatpush3.msra.mxu0 %v20_v3 }
   0x7   :  { %127 = vmatprep.subr.mxu0 %v142_v0 }
   0x8   :  { %128 = vmatpush3.msra.mxu0 %v19_v4 }
   0x9   :  { %129 = vmatprep.subr.mxu0 %v142_v0 }
   0xa   :  { %130 = vmatpush3.msra.mxu0 %v18_v5 }
   0xb   :  { %131 = vmatprep.subr.mxu0 %v142_v0 }
   0xc   :  { %132 = vmatpush3.msra.mxu0 %v17_v6 }
   0xd   :  { %133 = vmatprep.subr.mxu0 %v142_v0 }
   0xe   :  { %134 = vmatpush3.msra.mxu0 %v16_v7 }
   0xf   :  { %135 = vmatprep.subr.mxu0 %v142_v0 }
  0x10   :  { %136 = vmatpush3.msra.mxu0 %v15_v8 }
  0x11   :  { %138 = vmatmul.mubr.msk.f32.vlgmr.msra.gmra.mxu0 %vm30_vm1, %v14_v9 }
  0xd1   :  { %v100_v11 = vpop.f32.mrf.mxu0 }
  0xd2   :  { %v101_v12 = vadd.f32 %v110_v10, %v100_v11 }
  0xd3   :  { %v139_v13 = vpop.f32.mrf.mxu0 }
  0xd4   :  { %105 = vst.msk [vmem:[%s200_s3] sm:$0x3] %vm104_vm2, %v101_v12 }

// kernel: closed_call.12
= control target key start
LH: loop header
LB: loop body
LE: loop exit
PB: predicated region body
PF: predicated region fallthrough
CT: control target
= control target key end

     0   :  { %s1524_s0 = inlined_call_operand.vmem [shape: f32[5,2,128], index: 0, kind: input, shape index: {}, may-alias: {0,16}]   ;;  %s1525_s1 = inlined_call_operand.<no memory space> [shape: s32[], index: 1, kind: input, shape index: {}]   ;;  %s1526_s2 = inlined_call_operand.vmem [shape: f32[2,16], index: 2, kind: input, shape index: {}]   ;;  %s1527_s3 = inlined_call_operand.vmem [shape: f32[2,32], index: 3, kind: input, shape index: {}]   ;;  %s1528_s4 = inlined_call_operand.vmem [shape: f32[2,8,64], index: 4, kind: input, shape index: {}]   ;;  %s1529_s5 = inlined_call_operand.vmem [shape: f32[2,8,32], index: 5, kind: input, shape index: {}]   ;;  %s1530_s6 = inlined_call_operand.vmem [shape: f32[32,32], index: 6, kind: input, shape index: {}]   ;;  %s1531_s7 = inlined_call_operand.vmem [shape: f32[1,32], index: 7, kind: input, shape index: {}]   ;;  %s1532_s8 = inlined_call_operand.vmem [shape: f32[16,96], index: 8, kind: input, shape index: {}]   ;;  %s1533_s9 = inlined_call_operand.vmem [shape: f32[64,96], index: 9, kind: input, shape index: {}]   ;;  %s1534_s10 = inlined_call_operand.vmem [shape: f32[32,96], index: 10, kind: input, shape index: {}]   ;;  %s1535_s11 = inlined_call_operand.vmem [shape: f32[1,96], index: 11, kind: input, shape index: {}]   ;;  %s1536_s12 = inlined_call_operand.vmem [shape: f32[32,128], index: 12, kind: input, shape index: {}]   ;;  %s1537_s13 = inlined_call_operand.vmem [shape: f32[64,128], index: 13, kind: input, shape index: {}]   ;;  %s1538_s14 = inlined_call_operand.vmem [shape: f32[16,128], index: 14, kind: input, shape index: {}]   ;;  %s1539_s15 = inlined_call_operand.vmem [shape: f32[1,128], index: 15, kind: input, shape index: {}]   ;;  %s1540_s16 = inlined_call_operand.vmem [shape: f32[5,2,128], index: 16, kind: output, shape index: {0}, may-alias: {0,16}]   ;;  %s1541_s17 = inlined_call_operand.vmem [shape: f32[2,32], index: 17, kind: output, shape index: {1}]   ;;  %s1542_s18 = inlined_call_operand.vmem [shape: s32[2,1], index: 18, kind: output, shape index: {2}]  }
   0x1   :  { %1544 = sst [smem:[#allocation3_spill]] %s1525_s1 }
   0x2   :  { %1545 = sst [smem:[#allocation4_spill]] %s1526_s2 }
   0x3   :  { %1546 = sst [smem:[#allocation5_spill]] %s1536_s12 }
   0x4   :  { %s1547_s29 = sld [smem:[#allocation3_spill]] }
   0xa   :  { %s1013_s12 = sshll.u32 %s1547_s29, 1 }
   0xb   :  { %s1300_s19 = scalar_lea.vmem %s1540_s16, %s1013_s12  }
   0xc   :  { %v63_v0 = vld [vmem:[%s1530_s6 + $0x18] sm:$0xff]  ;;  %v1192_v1 = vmov 0.0   ;;  %v62_v2 = vld [vmem:[%s1530_s6 + $0x10] sm:$0xff]  ;;  %vm1193_vm0 = vmmov 0   ;;  %v61_v3 = vld [vmem:[%s1530_s6 + $0x8] sm:$0xff]  ;;  %vm64_vm1 = vcmask 261120   ;;  %v142_v8 = vlaneseq }
   0xd   :  { %1070 = vmatprep.subr.mxu0 %v1192_v1  ;;  %1078 = vmatprep.mubr.msk.f32.mxu0 %vm1193_vm0, %v1192_v1  ;;  %v60_v4 = vld [vmem:[%s1530_s6] sm:$0xff]  ;;  %v1194_v6 = vmov 1966171168   ;;  %v59_v21 = vld [vmem:[%s1529_s5 + $0x8] sm:$0xff]  ;;  %vm202_vm2 = vcmask 1041409   ;;  %vm205_vm3 = vcmask 58368  }
   0xe   :  { %1071 = vmatpush3.msra.mxu0 %v63_v0  ;;  %1081 = vmatprep.subr.mxu1 %v1192_v1  ;;  %v1325_v5 = vld [vmem:[%s1527_s3] sm:$0x3]  ;;  %v140_v7 = vunpack.c.l.s4 %v1194_v6  ;;  %v1333_v10 = vshrl.u32 %v142_v8, 7  ;;  %v1348_v32 = vand.u32 127, %v142_v8  ;;  %v1195_v40 = vmov 0   ;;  %s1548_s12 = sld [smem:[#allocation4_spill]] }
   0xf   :  { %1072 = vmatprep.subr.mxu0 %v1192_v1  ;;  %1083 = vmatprep.mubr.msk.f32.mxu1 %vm1193_vm0, %v1192_v1  ;;  %v58_v18 = vld [vmem:[%s1529_s5] sm:$0xff]  ;;  %vm510_vm4 = vcmask 130048   ;;  %v595_v6 = vld [vmem:[%s1534_s10 + $0x18] sm:$0xff]  ;;  %v593_v8 = vld [vmem:[%s1534_s10 + $0x8] sm:$0xff]  ;;  %vm270_vm5 = vcmask 64512   ;;  %s1196_s21 = smov 64  }
  0x10   :  { %1073 = vmatpush3.msra.mxu0 %v62_v2  ;;  %v141_v9 = vunpack.c.0.s8 %v140_v7  ;;  %v163_v14 = vsub.s32 0, %v1333_v10  ;;  %v1015_v25 = vld [vmem:[%s1531_s7] ss:$0 sm:$0xff]  ;;  %v1352_v34 = vsub.s32 %v1348_v32, %v1333_v10  ;;  %1173 = vset.pattern.permute.xlu0 %v1195_v40  ;;  %v216_v41 = vsub.s32 1, %v1333_v10  ;;  %v424_v2 = vld [vmem:[%s1532_s8 + $0x8] sm:$0xff]  ;;  %v594_v7 = vld [vmem:[%s1534_s10 + $0x10] sm:$0xff] }
  0x11   :  { %1074 = vmatprep.subr.mxu0 %v1192_v1  ;;  %1172 = vset.pattern.permute.xlu1 %v1195_v40  ;;  %v56_v60 = vld [vmem:[%s1528_s4] sm:$0xff]  ;;  %vm437_vm6 = vcmask 523264   ;;  %s1197_s25 = smov 96   ;;  %s1198_s3 = smov 32   ;;  %vm699_vm7 = vcmask 254976   ;;  %vm937_vm8 = vcmp.lt.s32.totalorder %v1348_v32, 24 }
  0x12   :  { %1075 = vmatpush3.msra.mxu0 %v61_v3  ;;  %v144_v11 = vsub.s32 %v141_v9, %v1333_v10  ;;  %1082 = vmatpush3.msra.mxu1 %v56_v60  ;;  %v423_v3 = vld [vmem:[%s1532_s8] sm:$0xff]  ;;  %v712_v10 = vld [vmem:[%s1537_s13 + $0x38] sm:$0xff]  ;;  %vm939_vm9 = vcmask 1041408   ;;  %vm960_vm12 = vcmask 1024  }
  0x13   :  { %1076 = vmatprep.subr.mxu0 %v1192_v1  ;;  %1086 = vmatprep.subr.mxu1 %v1192_v1  ;;  %v592_v9 = vld [vmem:[%s1534_s10] sm:$0xff] }
  0x14   :  { %1077 = vmatpush3.msra.mxu0 %v60_v4  ;;  %v1376_v4 = vld [vmem:[%s1548_s12] sm:$0x3]  ;;  %s1549_s12 = sld [smem:[#allocation5_spill]] }
  0x15   :  { %1079 = vmatmul.mubr.msk.f32.vlgmr.msra.gmra.mxu0 %vm64_vm1, %v1325_v5  ;;  %1110 = vmatprep.subr.mxu0 %v1192_v1 }
  0x16   :  { %1114 = vmatprep.mubr.msk.f32.mxu0 %vm1193_vm0, %v1192_v1  ;;  %1111 = vmatpush3.msra.mxu0 %v424_v2 }
  0x17   :  { %1112 = vmatprep.subr.mxu0 %v1192_v1 }
  0x18   :  { %1113 = vmatpush3.msra.mxu0 %v423_v3 }
  0x19   :  { %1117 = vmatprep.subr.mxu0 %v1192_v1  ;;  %1115 = vmatmul.mubr.msk.f32.vlgmr.msra.gmra.mxu0 %vm510_vm4, %v1376_v4 }
  0x1a   :  { %1118 = vmatpush3.msra.mxu0 %v595_v6  ;;  %1125 = vmatprep.mubr.msk.f32.mxu0 %vm1193_vm0, %v1192_v1  ;;  %v702_v60 = vld [vmem:[%s1549_s12 + $0x8] sm:$0xff] }
  0x1b   :  { %1119 = vmatprep.subr.mxu0 %v1192_v1 }
  0x1c   :  { %1120 = vmatpush3.msra.mxu0 %v594_v7 }
  0x1d   :  { %1121 = vmatprep.subr.mxu0 %v1192_v1 }
  0x1e   :  { %1122 = vmatpush3.msra.mxu0 %v593_v8  ;;  %v856_v8 = vld [vmem:[%s1538_s14 + $0x8] sm:$0xff] }
  0x1f   :  { %1123 = vmatprep.subr.mxu0 %v1192_v1 }
  0x20   :  { %1124 = vmatpush3.msra.mxu0 %v592_v9 }
  0x21   :  { %1126 = vmatmul.mubr.msk.f32.vlgmr.msra.gmra.mxu0 %vm64_vm1, %v1325_v5  ;;  %1128 = vmatprep.subr.mxu0 %v1192_v1 }
  0x22   :  { %1129 = vmatpush3.msra.mxu0 %v712_v10  ;;  %1144 = vmatprep.mubr.msk.f32.mxu0 %vm1193_vm0, %v1192_v1 }
  0x23   :  { %1130 = vmatprep.subr.mxu0 %v1192_v1 }
  0xd5   :  { %v134_v12 = vpop.f32.mrf.mxu0 }
  0xd6   :  { %v145_v13 = vrot.slane %v134_v12, %v144_v11  ;;  %v710_v12 = vld [vmem:[%s1537_s13 + $0x28] sm:$0xff] }
  0xd7   :  { %v1080_v15 = vpop.f32.mrf.mxu0 }
  0xd8   :  { %v146_v16 = vcombine.high %v145_v13, %v145_v13  ;;  %v153_v17 = vrot.slane %v145_v13, %v144_v11  ;;  %v709_v13 = vld [vmem:[%s1537_s13 + $0x20] sm:$0xff] }
  0xda   :  { %v160_v19 = vrot.slane %v146_v16, %v144_v11  ;;  %v164_v20 = vrot.slane %v153_v17, %v163_v14  ;;  %v711_v11 = vld [vmem:[%s1537_s13 + $0x30] sm:$0xff]  ;;  %v57_v16 = vld [vmem:[%s1528_s4 + $0x8] sm:$0xff] }
  0xdb   :  { %1131 = vmatpush3.msra.mxu0 %v711_v11 }
  0xdc   :  { %v168_v22 = vrot.slane %v160_v19, %v163_v14  ;;  %v171_v23 = vadd.f32 %v164_v20, %v58_v18  ;;  %1132 = vmatprep.subr.mxu0 %v1192_v1  ;;  %v432_v19 = vld [vmem:[%s1533_s9 + $0x38] sm:$0xff]  ;;  %v431_v20 = vld [vmem:[%s1533_s9 + $0x30] sm:$0xff] }
  0xdd   :  { %1133 = vmatpush3.msra.mxu0 %v710_v12 }
  0xde   :  { %v172_v24 = vadd.f32 %v168_v22, %v59_v21  ;;  %1174 = vtanh.f32 %v171_v23  ;;  %1134 = vmatprep.subr.mxu0 %v1192_v1  ;;  %v430_v21 = vld [vmem:[%s1533_s9 + $0x28] sm:$0xff]  ;;  %v429_v22 = vld [vmem:[%s1533_s9 + $0x20] sm:$0xff]  ;;  %v428_v23 = vld [vmem:[%s1533_s9 + $0x18] sm:$0xff] }
  0xdf   :  { %1135 = vmatpush3.msra.mxu0 %v709_v13 }
  0xe0   :  { %1176 = vtanh.f32 %v172_v24  ;;  %1136 = vmatprep.subr.mxu0 %v1192_v1  ;;  %v708_v24 = vld [vmem:[%s1537_s13 + $0x18] sm:$0xff] }
  0xe1   :  { %1137 = vmatpush3.msra.mxu0 %v708_v24 }
  0xe2   :  { %1138 = vmatprep.subr.mxu0 %v1192_v1 }
  0xeb   :  { %v1175_v26 = vpop.eup %1174 }
  0xec   :  { %v182_v27 = vmul.f32 %v1175_v26, %v1015_v25  ;;  %v707_v26 = vld [vmem:[%s1537_s13 + $0x10] sm:$0xff] }
  0xed   :  { %v1177_v28 = vpop.eup %1176  ;;  %1139 = vmatpush3.msra.mxu0 %v707_v26 }
  0xee   :  { %v184_v29 = vsel %vm64_vm1, %v182_v27, 0.0  ;;  %v183_v30 = vmul.f32 %v1177_v28, %v1015_v25  ;;  %v427_v25 = vld [vmem:[%s1533_s9 + $0x10] sm:$0xff]  ;;  %1140 = vmatprep.subr.mxu0 %v1192_v1  ;;  %v426_v27 = vld [vmem:[%s1533_s9 + $0x8] sm:$0xff] }
  0xef   :  { %185 = vadd.xlane.f32.xlu0 %v184_v29  ;;  %v706_v28 = vld [vmem:[%s1537_s13 + $0x8] sm:$0xff]  ;;  %v425_v29 = vld [vmem:[%s1533_s9] sm:$0xff] }
  0xf0   :  { %v187_v31 = vsel %vm64_vm1, %v183_v30, 0.0  ;;  %1141 = vmatpush3.msra.mxu0 %v706_v28  ;;  %v705_v30 = vld [vmem:[%s1537_s13] sm:$0xff] }
  0xf1   :  { %1142 = vmatprep.subr.mxu0 %v1192_v1 }
  0xf2   :  { %1143 = vmatpush3.msra.mxu0 %v705_v30 }
  0xf3   :  { %188 = vadd.xlane.f32.xlu0 %v187_v31  ;;  %v580_v31 = vpop.f32.mrf.mxu0 }
 0x178   :  { %v186_v33 = vpop.xlane.xlu0 %185 }
 0x179   :  { %v197_v36 = vrot.slane %v186_v33, %v1352_v34 }
 0x17c   :  { %v189_v35 = vpop.xlane.xlu0 %188 }
 0x17d   :  { %v201_v37 = vrot.slane %v189_v35, %v1352_v34 }
 0x17f   :  { %v203_v38 = vsel %vm202_vm2, %v201_v37, %v197_v36 }
 0x180   :  { %v206_v39 = vsel %vm205_vm3, %v203_v38, -inf }
 0x181   :  { %207 = vmax.xlane.f32.xlu1 %v206_v39 }
 0x20a   :  { %v208_v42 = vpop.xlane.xlu1 %207 }
 0x20b   :  { %v213_v43 = vrot.slane %v208_v42, %v163_v14  ;;  %v217_v44 = vrot.slane %v208_v42, %v216_v41 }
 0x20d   :  { %v220_v45 = vsub.f32 %v186_v33, %v213_v43  ;;  %v221_v46 = vsub.f32 %v189_v35, %v217_v44  ;;  %v1116_v33 = vpop.f32.mrf.mxu0  ;;  %v1020_v43 = vld [vmem:[%s1535_s11] ss:$0 sm:$0xff] }
 0x20f   :  { %v222_v47 = vmul.f32 1.442695, %v220_v45  ;;  %v224_v48 = vmul.f32 1.442695, %v221_v46 }
 0x211   :  { %1178 = vpow2.f32 %v222_v47 }
 0x212   :  { %1180 = vpow2.f32 %v224_v48 }
 0x21e   :  { %v1179_v49 = vpop.eup %1178 }
 0x21f   :  { %v1181_v50 = vpop.eup %1180  ;;  %229 = vperm.xlu1 %1172, %v1179_v49  }
 0x220   :  { %232 = vperm.xlu0 %1173, %v1181_v50  }
 0x29a   :  { %v230_v51 = vpop.permute.xlu1 %229 }
 0x29b   :  { %v233_v52 = vpop.permute.xlu0 %232  ;;  %v237_v53 = vrot.slane %v230_v51, %v1352_v34 }
 0x29c   :  { %v241_v54 = vrot.slane %v233_v52, %v1352_v34 }
 0x29e   :  { %v242_v55 = vsel %vm202_vm2, %v241_v54, %v237_v53 }
 0x29f   :  { %v244_v56 = vsel %vm205_vm3, %v242_v55, 0.0 }
 0x2a0   :  { %245 = vadd.xlane.f32.xlu1 %v244_v56 }
 0x329   :  { %v246_v57 = vpop.xlane.xlu1 %245 }
 0x32a   :  { %v251_v58 = vrot.slane %v246_v57, %v163_v14  ;;  %v255_v59 = vrot.slane %v246_v57, %v216_v41 }
 0x32c   :  { %1182 = vrcp.f32 %v251_v58  ;;  %v704_v58 = vld [vmem:[%s1549_s12 + $0x18] sm:$0xff] }
 0x32d   :  { %1184 = vrcp.f32 %v255_v59  ;;  %v703_v59 = vld [vmem:[%s1549_s12 + $0x10] sm:$0xff] }
 0x339   :  { %v1183_v61 = vpop.eup %1182 }
 0x33a   :  { %v259_v62 = vmul.f32 %v1183_v61, %v1179_v49  ;;  %v1185_v63 = vpop.eup %1184 }
 0x33b   :  { %v261_v0 = vmul.f32 %v1185_v63, %v1181_v50 }
 0x33c   :  { %264 = vperm.xlu0 %1173, %v259_v62   ;;  %v701_v62 = vld [vmem:[%s1549_s12] sm:$0xff] }
 0x340   :  { %345 = vperm.xlu0 %1173, %v261_v0  }
 0x3b7   :  { %v265_v14 = vpop.permute.xlu0 %264 }
 0x3b8   :  { %v269_v15 = vrot.slane %v265_v14, %v1352_v34  ;;  %v1026_v14 = vld [vmem:[%s1539_s15] ss:$0 sm:$0xff] }
 0x3ba   :  { %1084 = vmatmul.mubr.msk.f32.vlgmr.msra.gmra.mxu1 %vm270_vm5, %v269_v15 }
 0x3bb   :  { %1087 = vmatpush3.msra.mxu1 %v57_v16  ;;  %v346_v17 = vpop.permute.xlu0 %345  ;;  %1088 = vmatprep.mubr.msk.f32.mxu1 %vm1193_vm0, %v1192_v1 }
 0x3bc   :  { %v350_v18 = vrot.slane %v346_v17, %v1352_v34  ;;  %1091 = vmatprep.subr.mxu1 %v1192_v1  ;;  %v662_v34 = vpop.f32.mrf.mxu0 }
 0x3bd   :  { %674 = vrot.lane.b32.xlu1 %v662_v34, %s1196_s21 }
 0x3be   :  { %1089 = vmatmul.mubr.msk.f32.vlgmr.msra.gmra.mxu1 %vm270_vm5, %v350_v18  ;;  %v1127_v35 = vpop.f32.mrf.mxu0 }
 0x3bf   :  { %1092 = vmatpush3.msra.mxu1 %v432_v19  ;;  %1107 = vmatprep.mubr.msk.f32.mxu1 %vm1193_vm0, %v1192_v1 }
 0x3c0   :  { %1093 = vmatprep.subr.mxu1 %v1192_v1 }
 0x3c1   :  { %1094 = vmatpush3.msra.mxu1 %v431_v20 }
 0x3c2   :  { %1095 = vmatprep.subr.mxu1 %v1192_v1 }
 0x3c3   :  { %1096 = vmatpush3.msra.mxu1 %v430_v21 }
 0x3c4   :  { %1097 = vmatprep.subr.mxu1 %v1192_v1 }
 0x3c5   :  { %1098 = vmatpush3.msra.mxu1 %v429_v22 }
 0x3c6   :  { %1099 = vmatprep.subr.mxu1 %v1192_v1 }
 0x3c7   :  { %1100 = vmatpush3.msra.mxu1 %v428_v23 }
 0x3c8   :  { %1101 = vmatprep.subr.mxu1 %v1192_v1 }
 0x3c9   :  { %1102 = vmatpush3.msra.mxu1 %v427_v25 }
 0x3ca   :  { %1103 = vmatprep.subr.mxu1 %v1192_v1 }
 0x3cb   :  { %1104 = vmatpush3.msra.mxu1 %v426_v27 }
 0x3cc   :  { %1105 = vmatprep.subr.mxu1 %v1192_v1 }
 0x3cd   :  { %1106 = vmatpush3.msra.mxu1 %v425_v29 }
 0x3ce   :  { %1147 = vmatprep.subr.mxu1 %v1192_v1 }
 0x42f   :  { %v675_v53 = vpop.permute.xlu1 %674 }
 0x47a   :  { %v339_v36 = vpop.f32.mrf.mxu1 }
 0x47c   :  { %v1085_v37 = vpop.f32.mrf.mxu1 }
 0x47e   :  { %v419_v38 = vpop.f32.mrf.mxu1 }
 0x47f   :  { %v435_v39 = vrot.slane %v419_v38, 7 }
 0x480   :  { %v1090_v40 = vpop.f32.mrf.mxu1 }
 0x481   :  { %v436_v41 = vsel %vm202_vm2, %v435_v39, %v339_v36 }
 0x482   :  { %1108 = vmatmul.mubr.msk.f32.vlgmr.msra.gmra.mxu1 %vm437_vm6, %v436_v41  ;;  %1145 = vmatmul.mubr.msk.f32.vlgmr.msra.gmra.mxu0 %vm437_vm6, %v436_v41 }
 0x483   :  { %1155 = vmatprep.mubr.msk.f32.mxu1 %vm1193_vm0, %v1192_v1  ;;  %1148 = vmatpush3.msra.mxu1 %v704_v58 }
 0x484   :  { %1149 = vmatprep.subr.mxu1 %v1192_v1 }
 0x485   :  { %1150 = vmatpush3.msra.mxu1 %v703_v59 }
 0x486   :  { %1151 = vmatprep.subr.mxu1 %v1192_v1 }
 0x487   :  { %1152 = vmatpush3.msra.mxu1 %v702_v60 }
 0x488   :  { %1153 = vmatprep.subr.mxu1 %v1192_v1 }
 0x489   :  { %1154 = vmatpush3.msra.mxu1 %v701_v62 }
 0x48a   :  { %1158 = vmatprep.subr.mxu1 %v1192_v1 }
 0x542   :  { %v506_v42 = vpop.f32.mrf.mxu1  ;;  %v779_v44 = vpop.f32.mrf.mxu0 }
 0x543   :  { %v581_v45 = vadd.f32 %v580_v31, %v506_v42 }
 0x544   :  { %v1109_v46 = vpop.f32.mrf.mxu1  ;;  %v1146_v47 = vpop.f32.mrf.mxu0 }
 0x545   :  { %v591_v48 = vadd.f32 %v1020_v43, %v581_v45 }
 0x547   :  { %v666_v49 = vadd.f32 %v662_v34, %v591_v48 }
 0x549   :  { %v1022_v50 = vmul.f32 -1.442695, %v666_v49 }
 0x54b   :  { %1186 = vpow2.f32 %v1022_v50 }
 0x558   :  { %v1187_v51 = vpop.eup %1186 }
 0x559   :  { %v670_v52 = vadd.f32 1.0, %v1187_v51 }
 0x55b   :  { %1188 = vrcp.f32 %v670_v52 }
 0x568   :  { %v1189_v54 = vpop.eup %1188 }
 0x569   :  { %v677_v55 = vmul.f32 %v1189_v54, %v675_v53  ;;  %v684_v0 = vsub.f32 1.0, %v1189_v54 }
 0x56b   :  { %679 = vrot.lane.b32.xlu0 %v677_v55, %s1196_s21 }
 0x5dd   :  { %v680_v56 = vpop.permute.xlu0 %679 }
 0x5de   :  { %v682_v57 = vadd.f32 %v680_v56, %v591_v48 }
 0x5e0   :  { %1190 = vtanh.f32 %v682_v57 }
 0x5ed   :  { %v1191_v61 = vpop.eup %1190 }
 0x5ee   :  { %686 = vrot.lane.b32.xlu0 %v1191_v61, %s1197_s25 }
 0x5f2   :  { %690 = vrot.lane.b32.xlu0 %v1325_v5, %s1198_s3  ;;  %v855_v5 = vld [vmem:[%s1538_s14] sm:$0xff] }
 0x660   :  { %v687_v63 = vpop.permute.xlu0 %686 }
 0x661   :  { %v689_v3 = vmul.f32 %v687_v63, %v684_v0 }
 0x664   :  { %v691_v2 = vpop.permute.xlu0 %690 }
 0x665   :  { %v693_v6 = vmul.f32 %v1189_v54, %v691_v2 }
 0x667   :  { %v694_v7 = vadd.f32 %v693_v6, %v689_v3 }
 0x669   :  { %696 = vrot.lane.b32.xlu0 %v694_v7, %s1197_s25 }
 0x6db   :  { %v697_v9 = vpop.permute.xlu0 %696 }
 0x6dc   :  { %700 = vst.msk [vmem:[%s1541_s17] sm:$0x3] %vm699_vm7, %v697_v9  ;;  %1156 = vmatmul.mubr.msk.f32.vlgmr.msra.gmra.mxu1 %vm64_vm1, %v697_v9 }
 0x6dd   :  { %1159 = vmatpush3.msra.mxu1 %v856_v8  ;;  %1162 = vmatprep.mubr.msk.f32.mxu1 %vm1193_vm0, %v1192_v1 }
 0x6de   :  { %1160 = vmatprep.subr.mxu1 %v1192_v1 }
 0x6df   :  { %1161 = vmatpush3.msra.mxu1 %v855_v5 }
 0x6e0   :  { %1163 = vmatmul.mubr.msk.f32.vlgmr.msra.gmra.mxu1 %vm510_vm4, %v1376_v4 }
 0x79c   :  { %v851_v10 = vpop.f32.mrf.mxu1 }
 0x79d   :  { %v852_v12 = vadd.f32 %v851_v10, %v779_v44 }
 0x79e   :  { %v1157_v11 = vpop.f32.mrf.mxu1 }
 0x7a0   :  { %v923_v13 = vpop.f32.mrf.mxu1 }
 0x7a1   :  { %v927_v15 = vadd.f32 %v923_v13, %v852_v12 }
 0x7a2   :  { %v1164_v16 = vpop.f32.mrf.mxu1 }
 0x7a3   :  { %v935_v17 = vadd.f32 %v1026_v14, %v927_v15 }
 0x7a5   :  { %936 = vst [vmem:[#allocation2] sm:$0x3] %v935_v17  ;;  %v938_v1 = vsel %vm937_vm8, %v935_v17, -inf }
 0x7a6   :  { %v940_v18 = vsel %vm939_vm9, %v938_v1, -inf }
 0x7a7   :  { %941 = vmax.xlane.f32.xlu1 %v940_v18 }
 0x7ac   :  { %v980_v4 = vld [vmem:[#allocation2] sm:$0x3] }
 0x7ad   :  { %981 = vst [vmem:[%s1300_s19] sm:$0x3] %v980_v4 }
 0x830   :  { %v942_v19 = vpop.xlane.xlu1 %941 }
 0x831   :  { %vm943_vm10 = vcmp.ge.f32.partialorder %v938_v1, %v942_v19 }
 0x832   :  { %v944_v20 = vsel %vm943_vm10, %v1348_v32, 128 }
 0x833   :  { %v945_v21 = vsel %vm939_vm9, %v944_v20, 2147483647 }
 0x834   :  { %v947_v22 = vshra.s32 %v945_v21, 16  ;;  %v946_v24 = vand.u32 65535, %v945_v21 }
 0x836   :  { %v949_v23 = vcvt.s32.f32 %v947_v22  ;;  %v948_v26 = vcvt.s32.f32 %v946_v24 }
 0x838   :  { %950 = vmin.xlane.f32.xlu0 %v949_v23 }
 0x8c1   :  { %v951_v25 = vpop.xlane.xlu0 %950 }
 0x8c2   :  { %vm952_vm11 = vcmp.eq.f32.partialorder %v949_v23, %v951_v25  ;;  %v957_v28 = vcvt.f32.s32 %v951_v25 }
 0x8c3   :  { %v953_v27 = vsel %vm952_vm11, %v948_v26, inf }
 0x8c4   :  { %954 = vmin.xlane.f32.xlu0 %v953_v27  ;;  %v958_v30 = vshll.u32 %v957_v28, 16 }
 0x94d   :  { %v955_v29 = vpop.xlane.xlu0 %954 }
 0x94e   :  { %v956_v31 = vcvt.f32.s32 %v955_v29 }
 0x950   :  { %v959_v33 = vadd.s32 %v958_v30, %v956_v31 }
 0x952   :  { %961 = vst.msk [vmem:[%s1542_s18] sm:$0x3] %vm960_vm12, %v959_v33 }

</bundles_post_ra>
